<compile_context>
chip_gen: v7x
topology: tpu7x:2x2x1
jax: 0.10.0
libtpu: 0.0.40
codegen_flags: <defaults>
</compile_context>

<pallas_src>
import functools

import jax
import jax.numpy as jnp
from jax.experimental import pallas as pl
from jax.experimental.pallas import tpu as pltpu


def _combined_loss_kernel(logits_ref, target_ref, out_ref, acc_ref, *,
                          weight_dice, weight_ce, smooth, n_total, tile_n):
    i = pl.program_id(0)

    @pl.when(i == 0)
    def _init():
        acc_ref[0] = jnp.float32(0.0)   # running sum of per-row cross entropy
        acc_ref[1] = jnp.float32(0.0)   # running sum of p[i, target_i] (dice inter)

    logits = logits_ref[...].astype(jnp.float32)              # (TILE_N, C)
    tgt = target_ref[...]                                      # (TILE_N, 1) int32
    tn, c = logits.shape

    # Mask rows beyond N (last, possibly partial, tile).  Mask the logits
    # themselves so padded-row garbage can never produce inf/nan through exp.
    row_ids = jax.lax.broadcasted_iota(jnp.int32, (tn, 1), 0) + i * tile_n
    valid_b = row_ids < n_total                                # (TILE_N, 1) bool
    valid_f = valid_b.astype(jnp.float32)
    logits = jnp.where(valid_b, logits, 0.0)

    # Numerically-stable log-softmax pieces (row-wise); exp computed once.
    m = jnp.max(logits, axis=-1, keepdims=True)                # (TILE_N, 1)
    shifted = logits - m
    exp_shifted = jnp.exp(shifted)                             # (TILE_N, C), one EUP pass
    s = jnp.sum(exp_shifted, axis=-1, keepdims=True)           # (TILE_N, 1)

    # Target-class entries via vsel over an iota; no float one-hot built.
    class_ids = jax.lax.broadcasted_iota(jnp.int32, (tn, c), 1)
    is_tgt = class_ids == tgt                                  # (TILE_N, C) bool
    sel = jnp.sum(jnp.where(is_tgt, shifted, 0.0),
                  axis=-1, keepdims=True)                      # shifted logit of target
    exp_sel = jnp.sum(jnp.where(is_tgt, exp_shifted, 0.0),
                      axis=-1, keepdims=True)                  # exp(shifted) of target

    ce_rows = (jnp.log(s) - sel) * valid_f                     # per-row CE
    p_t = (exp_sel / s) * valid_f                              # softmax prob of target

    acc_ref[0] += jnp.sum(ce_rows)
    acc_ref[1] += jnp.sum(p_t)

    @pl.when(i == pl.num_programs(0) - 1)
    def _finalize():
        n_f = jnp.float32(n_total)
        ce = acc_ref[0] / n_f
        inter = acc_ref[1]
        union = 2.0 * n_f          # sum(softmax) == N and sum(one_hot) == N exactly
        dice = 1.0 - (2.0 * inter + smooth) / (union + smooth)
        out_ref[0] = weight_dice * dice + weight_ce * ce


def _choose_tile_n(n, c, dtype_bytes):
    """Largest row tile whose logits block stays <= ~8 MiB (VMEM-padded lanes)."""
    c_pad = max(128, ((c + 127) // 128) * 128)      # lane padding for VMEM accounting
    budget = 8 * 1024 * 1024                        # per buffer; 2x buffered < 32 MiB scoped
    tile = max(8, (budget // (c_pad * max(dtype_bytes, 1))) // 8 * 8)
    n_pad = ((n + 7) // 8) * 8
    return int(min(tile, n_pad))


def combined_loss(logits, target, *, weight_dice=0.5, weight_ce=0.5,
                  smooth=1.0, tile_n=None):
    """logits: (N, C) float, target: (N,) int -> scalar f32 loss."""
    n, c = logits.shape
    dtype_bytes = jnp.dtype(logits.dtype).itemsize
    if tile_n is None:
        tile_n = _choose_tile_n(n, c, dtype_bytes)
    num_tiles = pl.cdiv(n, tile_n)

    target_2d = target.reshape(n, 1).astype(jnp.int32)

    kernel = functools.partial(
        _combined_loss_kernel,
        weight_dice=float(weight_dice),
        weight_ce=float(weight_ce),
        smooth=float(smooth),
        n_total=int(n),
        tile_n=int(tile_n),
    )

    cost = pl.CostEstimate(
        flops=7 * n * c,
        transcendentals=n * c + n,          # exp over logits + one log per row
        bytes_accessed=n * c * dtype_bytes + n * 4 + 4,
    )

    out = pl.pallas_call(
        kernel,
        out_shape=jax.ShapeDtypeStruct((1,), jnp.float32),
        grid_spec=pltpu.PrefetchScalarGridSpec(
            num_scalar_prefetch=0,
            grid=(num_tiles,),
            in_specs=[
                pl.BlockSpec((tile_n, c), lambda i: (i, 0)),   # logits tile
                pl.BlockSpec((tile_n, 1), lambda i: (i, 0)),   # target tile
            ],
            out_specs=pl.BlockSpec(memory_space=pltpu.SMEM),    # scalar loss
            scratch_shapes=[pltpu.SMEM((2,), jnp.float32)],     # [ce_sum, inter_sum]
        ),
        compiler_params=pltpu.CompilerParams(
            dimension_semantics=("arbitrary",),
            vmem_limit_bytes=32 * 1024 * 1024,
        ),
        cost_estimate=cost,
    )(logits, target_2d)   # native dtype streamed; upcast happens in-kernel
    return out[0]


def _reference_loss(logits, target, weight_dice=0.5, weight_ce=0.5, smooth=1.0):
    """Pure-JAX reference mirroring the PyTorch semantics."""
    n, c = logits.shape
    onehot = jax.nn.one_hot(target, c, dtype=jnp.float32)
    log_p = jax.nn.log_softmax(logits.astype(jnp.float32), axis=-1)
    ce = -jnp.mean(jnp.sum(onehot * log_p, axis=-1))
    probs = jax.nn.softmax(logits.astype(jnp.float32), axis=-1)
    inter = jnp.sum(probs * onehot)
    union = jnp.sum(probs) + jnp.sum(onehot)
    dice = 1.0 - (2.0 * inter + smooth) / (union + smooth)
    return weight_dice * dice + weight_ce * ce


if __name__ == "__main__":
    key = jax.random.PRNGKey(0)
    k_logits, k_target = jax.random.split(key)

    # Small shape consistent with the module contract: (N, C) logits, (N,) labels.
    N, C = 8, 32
    logits = jax.random.normal(k_logits, (N, C), dtype=jnp.float32)
    target = jax.random.randint(k_target, (N,), 0, C, dtype=jnp.int32)

    loss = combined_loss(logits, target, weight_dice=0.5, weight_ce=0.5)
    loss = jax.block_until_ready(loss)
    ref = _reference_loss(logits, target)
    assert jnp.allclose(loss, ref, rtol=1e-5, atol=1e-5), (loss, ref)

    # Exercise multi-step grid + partial last tile (masking / accumulator path).
    N2, C2 = 50, 32
    logits2 = jax.random.normal(k_logits, (N2, C2), dtype=jnp.float32)
    target2 = jax.random.randint(k_target, (N2,), 0, C2, dtype=jnp.int32)
    loss2 = combined_loss(logits2, target2, tile_n=16)
    loss2 = jax.block_until_ready(loss2)
    ref2 = _reference_loss(logits2, target2)
    assert jnp.allclose(loss2, ref2, rtol=1e-5, atol=1e-5), (loss2, ref2)

    # bf16 input path (native dtype streamed, f32 math in-register).
    logits3 = logits2.astype(jnp.bfloat16)
    loss3 = jax.block_until_ready(combined_loss(logits3, target2, tile_n=16))
    ref3 = _reference_loss(logits3, target2)
    assert jnp.allclose(loss3, ref3, rtol=2e-2, atol=2e-2), (loss3, ref3)

    print("KERNEL_OK")
</pallas_src>

<mosaic_0001>
module attributes {stable_mosaic.version = 11 : i64} {
  func.func @_combined_loss_kernel(%arg0: i32, %arg1: memref<8x32xf32, #tpu.memory_space<vmem>>, %arg2: memref<8x1xi32, #tpu.memory_space<vmem>>, %arg3: memref<1xf32, #tpu.memory_space<smem>>, %arg4: memref<2xf32, #tpu.memory_space<smem>>) attributes {dimension_semantics = [#tpu.dimension_semantics<arbitrary>], iteration_bounds = array<i64: 1>, scalar_prefetch = 0 : i64, scratch_operands = 1 : i64, tpu.core_type = #tpu.core_type<tc>, window_params = [{transform_indices = @transform_0, window_bounds = array<i64: 8, 32>}, {transform_indices = @transform_1, window_bounds = array<i64: 8, 1>}, {transform_indices = @transform_2, window_bounds = array<i64: 1>}]} {
    %c0_i32 = arith.constant 0 : i32
    %0 = arith.cmpi eq, %arg0, %c0_i32 : i32
    %1 = arith.extui %0 : i1 to i32
    %c0_i32_0 = arith.constant 0 : i32
    %2 = arith.cmpi ne, %1, %c0_i32_0 : i32
    scf.if %2 {
      %cst_18 = arith.constant 0.000000e+00 : f32
      %c0_19 = arith.constant 0 : index
      %57 = memref.load %arg4[%c0_19] : memref<2xf32, #tpu.memory_space<smem>>
      memref.store %cst_18, %arg4[%c0_19] : memref<2xf32, #tpu.memory_space<smem>>
      %cst_20 = arith.constant 0.000000e+00 : f32
      %c1_21 = arith.constant 1 : index
      %58 = memref.load %arg4[%c1_21] : memref<2xf32, #tpu.memory_space<smem>>
      memref.store %cst_20, %arg4[%c1_21] : memref<2xf32, #tpu.memory_space<smem>>
    } else {
    }
    %c0 = arith.constant 0 : index
    %c0_1 = arith.constant 0 : index
    %3 = vector.load %arg1[%c0, %c0_1] : memref<8x32xf32, #tpu.memory_space<vmem>>, vector<8x32xf32>
    %c0_2 = arith.constant 0 : index
    %c0_3 = arith.constant 0 : index
    %4 = vector.load %arg2[%c0_2, %c0_3] : memref<8x1xi32, #tpu.memory_space<vmem>>, vector<8x1xi32>
    %5 = tpu.iota {dimensions = array<i32: 0>} : vector<8x1xi32>
    %c8_i32 = arith.constant 8 : i32
    %6 = arith.muli %arg0, %c8_i32 : i32
    %7 = vector.broadcast %6 : i32 to vector<8x1xi32>
    %8 = arith.addi %5, %7 : vector<8x1xi32>
    %c8_i32_4 = arith.constant 8 : i32
    %9 = vector.broadcast %c8_i32_4 : i32 to vector<8x1xi32>
    %10 = arith.cmpi slt, %8, %9 : vector<8x1xi32>
    %11 = arith.extui %10 : vector<8x1xi1> to vector<8x1xi32>
    %12 = arith.sitofp %11 : vector<8x1xi32> to vector<8x1xf32>
    %cst = arith.constant 0.000000e+00 : f32
    %13 = vector.shape_cast %10 : vector<8x1xi1> to vector<8x1xi1>
    %14 = vector.broadcast %13 : vector<8x1xi1> to vector<8x32xi1>
    %15 = vector.broadcast %cst : f32 to vector<8x32xf32>
    %16 = arith.select %14, %3, %15 : vector<8x32xi1>, vector<8x32xf32>
    %cst_5 = arith.constant dense<0xFF800000> : vector<8xf32>
    %17 = vector.multi_reduction <maximumf>, %16, %cst_5 [1] : vector<8x32xf32> to vector<8xf32>
    %18 = vector.shape_cast %17 : vector<8xf32> to vector<8x1xf32>
    %19 = vector.broadcast %18 : vector<8x1xf32> to vector<8x32xf32>
    %20 = arith.subf %16, %19 : vector<8x32xf32>
    %21 = math.exp %20 : vector<8x32xf32>
    %cst_6 = arith.constant dense<0.000000e+00> : vector<8xf32>
    %22 = vector.multi_reduction <add>, %21, %cst_6 [1] : vector<8x32xf32> to vector<8xf32>
    %23 = vector.shape_cast %22 : vector<8xf32> to vector<8x1xf32>
    %24 = tpu.iota {dimensions = array<i32: 1>} : vector<8x32xi32>
    %25 = vector.broadcast %4 : vector<8x1xi32> to vector<8x32xi32>
    %26 = arith.cmpi eq, %24, %25 : vector<8x32xi32>
    %cst_7 = arith.constant 0.000000e+00 : f32
    %27 = vector.broadcast %cst_7 : f32 to vector<8x32xf32>
    %28 = arith.select %26, %20, %27 : vector<8x32xi1>, vector<8x32xf32>
    %cst_8 = arith.constant dense<0.000000e+00> : vector<8xf32>
    %29 = vector.multi_reduction <add>, %28, %cst_8 [1] : vector<8x32xf32> to vector<8xf32>
    %30 = vector.shape_cast %29 : vector<8xf32> to vector<8x1xf32>
    %cst_9 = arith.constant 0.000000e+00 : f32
    %31 = vector.broadcast %cst_9 : f32 to vector<8x32xf32>
    %32 = arith.select %26, %21, %31 : vector<8x32xi1>, vector<8x32xf32>
    %cst_10 = arith.constant dense<0.000000e+00> : vector<8xf32>
    %33 = vector.multi_reduction <add>, %32, %cst_10 [1] : vector<8x32xf32> to vector<8xf32>
    %34 = vector.shape_cast %33 : vector<8xf32> to vector<8x1xf32>
    %35 = math.log %23 : vector<8x1xf32>
    %36 = arith.subf %35, %30 : vector<8x1xf32>
    %37 = arith.mulf %36, %12 : vector<8x1xf32>
    %38 = arith.divf %34, %23 : vector<8x1xf32>
    %39 = arith.mulf %38, %12 : vector<8x1xf32>
    %c0_11 = arith.constant 0 : index
    %40 = memref.load %arg4[%c0_11] : memref<2xf32, #tpu.memory_space<smem>>
    %41 = vector.shape_cast %37 : vector<8x1xf32> to vector<1x8x1xf32>
    %cst_12 = arith.constant dense<0.000000e+00> : vector<1xf32>
    %42 = vector.multi_reduction <add>, %41, %cst_12 [1, 2] : vector<1x8x1xf32> to vector<1xf32>
    %43 = vector.shape_cast %42 : vector<1xf32> to vector<1x1x1xf32>
    %44 = vector.extract %43[0, 0, 0] : f32 from vector<1x1x1xf32>
    %45 = arith.addf %40, %44 : f32
    %c0_13 = arith.constant 0 : index
    %46 = memref.load %arg4[%c0_13] : memref<2xf32, #tpu.memory_space<smem>>
    memref.store %45, %arg4[%c0_13] : memref<2xf32, #tpu.memory_space<smem>>
    %c1 = arith.constant 1 : index
    %47 = memref.load %arg4[%c1] : memref<2xf32, #tpu.memory_space<smem>>
    %48 = vector.shape_cast %39 : vector<8x1xf32> to vector<1x8x1xf32>
    %cst_14 = arith.constant dense<0.000000e+00> : vector<1xf32>
    %49 = vector.multi_reduction <add>, %48, %cst_14 [1, 2] : vector<1x8x1xf32> to vector<1xf32>
    %50 = vector.shape_cast %49 : vector<1xf32> to vector<1x1x1xf32>
    %51 = vector.extract %50[0, 0, 0] : f32 from vector<1x1x1xf32>
    %52 = arith.addf %47, %51 : f32
    %c1_15 = arith.constant 1 : index
    %53 = memref.load %arg4[%c1_15] : memref<2xf32, #tpu.memory_space<smem>>
    memref.store %52, %arg4[%c1_15] : memref<2xf32, #tpu.memory_space<smem>>
    %c0_i32_16 = arith.constant 0 : i32
    %54 = arith.cmpi eq, %arg0, %c0_i32_16 : i32
    %55 = arith.extui %54 : i1 to i32
    %c0_i32_17 = arith.constant 0 : i32
    %56 = arith.cmpi ne, %55, %c0_i32_17 : i32
    scf.if %56 {
      %c0_18 = arith.constant 0 : index
      %57 = memref.load %arg4[%c0_18] : memref<2xf32, #tpu.memory_space<smem>>
      %cst_19 = arith.constant 8.000000e+00 : f32
      %58 = arith.divf %57, %cst_19 : f32
      %c1_20 = arith.constant 1 : index
      %59 = memref.load %arg4[%c1_20] : memref<2xf32, #tpu.memory_space<smem>>
      %cst_21 = arith.constant 2.000000e+00 : f32
      %cst_22 = arith.constant 8.000000e+00 : f32
      %60 = arith.mulf %cst_21, %cst_22 : f32
      %cst_23 = arith.constant 2.000000e+00 : f32
      %61 = arith.mulf %cst_23, %59 : f32
      %cst_24 = arith.constant 1.000000e+00 : f32
      %62 = arith.addf %61, %cst_24 : f32
      %cst_25 = arith.constant 1.000000e+00 : f32
      %63 = arith.addf %60, %cst_25 : f32
      %64 = arith.divf %62, %63 : f32
      %cst_26 = arith.constant 1.000000e+00 : f32
      %65 = arith.subf %cst_26, %64 : f32
      %cst_27 = arith.constant 5.000000e-01 : f32
      %66 = arith.mulf %cst_27, %65 : f32
      %cst_28 = arith.constant 5.000000e-01 : f32
      %67 = arith.mulf %cst_28, %58 : f32
      %68 = arith.addf %66, %67 : f32
      %c0_29 = arith.constant 0 : index
      %69 = memref.load %arg3[%c0_29] : memref<1xf32, #tpu.memory_space<smem>>
      memref.store %68, %arg3[%c0_29] : memref<1xf32, #tpu.memory_space<smem>>
    } else {
    }
    return
  }
  func.func @transform_0(%arg0: i32) -> (i32, i32) {
    %c0_i32 = arith.constant 0 : i32
    %c0_i32_0 = arith.constant 0 : i32
    return %arg0, %c0_i32 : i32, i32
  }
  func.func @transform_1(%arg0: i32) -> (i32, i32) {
    %c0_i32 = arith.constant 0 : i32
    %c0_i32_0 = arith.constant 0 : i32
    return %arg0, %c0_i32 : i32, i32
  }
  func.func @transform_2(%arg0: i32) -> i32 {
    %c0_i32 = arith.constant 0 : i32
    %c0_i32_0 = arith.constant 0 : i32
    return %c0_i32 : i32
  }
}

</mosaic_0001>

<bundles_post_ra>
// kernel: tpu_custom_call.1
= control target key start
LH: loop header
LB: loop body
LE: loop exit
PB: predicated region body
PF: predicated region fallthrough
CT: control target
= control target key end

     0   :  { %vm32_vm0 = vcmask 261120   ;;  %s190_s0 = inlined_call_operand.vmem [shape: f32[8,32], index: 0, kind: input, shape index: {}]   ;;  %s191_s1 = inlined_call_operand.vmem [shape: s32[8,1], index: 1, kind: input, shape index: {}]   ;;  %s192_s2 = inlined_call_operand.hbm [shape: f32[1], index: 2, kind: output, shape index: {}]  }
   0x1   :  { %v20_v0 = vld [vmem:[%s190_s0] sm:$0xff] }
   0x2   :  { %7 = vsyncpa [#allocation4], 0  ;;  %v33_v1 = vsel %vm32_vm0, %v20_v0, -inf  ;;  %v151_v2 = vmov 0   ;;  %v21_v3 = vld [vmem:[%s191_s1] sm:$0xff]  ;;  %v42_v7 = vlaneseq  ;;  %vm64_vm2 = vcmask 7168  }
   0x3   :  { %132 = vset.pattern.permute.xlu0 %v151_v2  ;;  %s139_s23 = scalar_lea.hbm %s192_s2, 16 }
   0x4   :  { %34 = vmax.xlane.f32.xlu0 %v33_v1  ;;  %v43_v8 = vand.u32 127, %v42_v7  ;;  %p140_p0 = scmp.ne.s32.totalorder %s192_s2, %s139_s23  ;;  %p143_p1 = scmp.lt.u32.totalorder %s139_s23, %s192_s2 }
   0x6   :  { %p145_p2 = pnand %p143_p1, %p140_p0 }
  0x1a   :  { %45 = vperm.xlu0 %132, %v21_v3  }
  0x91   :  { %v35_v4 = vpop.xlane.xlu0 %34 }
  0x92   :  { %v36_v5 = vsub.f32 %v20_v0, %v35_v4 }
  0x94   :  { %v37_v6 = vmul.f32 1.442695, %v36_v5 }
  0x96   :  { %133 = vpow2.f32 %v37_v6 }
  0x99   :  { %v46_v9 = vpop.permute.xlu0 %45 }
  0x9a   :  { %vm47_vm1 = vcmp.eq.s32.totalorder %v43_v8, %v46_v9 }
  0x9b   :  { %v48_v12 = vsel %vm47_vm1, %v36_v5, 0.0 }
  0x9c   :  { %v49_v13 = vsel %vm32_vm0, %v48_v12, 0.0 }
  0xa0   :  { %v134_v10 = vpop.eup %133 }
  0xa1   :  { %v39_v11 = vsel %vm32_vm0, %v134_v10, 0.0  ;;  %v52_v14 = vsel %vm47_vm1, %v134_v10, 0.0 }
  0xa2   :  { %40 = vadd.xlane.f32.xlu1 %v39_v11  ;;  %v53_v15 = vsel %vm32_vm0, %v52_v14, 0.0 }
  0xa6   :  { %50 = vadd.xlane.f32.xlu1 %v49_v13 }
  0xaa   :  { %54 = vadd.xlane.f32.xlu1 %v53_v15 }
 0x12f   :  { %v41_v16 = vpop.xlane.xlu1 %40 }
 0x130   :  { %135 = vlog2.f32 %v41_v16 }
 0x131   :  { %137 = vrcp.f32 %v41_v16 }
 0x133   :  { %v51_v17 = vpop.xlane.xlu1 %50 }
 0x137   :  { %v55_v22 = vpop.xlane.xlu1 %54 }
 0x13a   :  { %v136_v18 = vpop.eup %135 }
 0x13b   :  { %v57_v19 = vmul.f32 0.6931472, %v136_v18  ;;  %v138_v20 = vpop.eup %137 }
 0x13c   :  { %v61_v23 = vmul.f32 %v138_v20, %v55_v22 }
 0x13d   :  { %v58_v21 = vsub.f32 %v57_v19, %v51_v17 }
 0x13e   :  { %v79_v25 = vsel %vm64_vm2, %v61_v23, 0.0 }
 0x13f   :  { %v65_v24 = vsel %vm64_vm2, %v58_v21, 0.0 }
 0x140   :  { %66 = vadd.xlane.f32.xlu1 %v65_v24 }
 0x144   :  { %80 = vadd.xlane.f32.xlu1 %v79_v25 }
 0x1cd   :  { %v67_v26 = vpop.xlane.xlu1 %66 }
 0x1ce   :  { %v68_v27 = vrot.slane %v67_v26, 4 }
 0x1d0   :  { %v69_v28 = vadd.f32 %v68_v27, %v67_v26 }
 0x1d1   :  { %v81_v29 = vpop.xlane.xlu1 %80 }
 0x1d2   :  { %v70_v30 = vrot.slane %v69_v28, 2  ;;  %v82_v31 = vrot.slane %v81_v29, 4 }
 0x1d4   :  { %v83_v32 = vadd.f32 %v82_v31, %v81_v29  ;;  %v71_v33 = vadd.f32 %v70_v30, %v69_v28 }
 0x1d6   :  { %v84_v34 = vrot.slane %v83_v32, 2  ;;  %v72_v35 = vrot.slane %v71_v33, 1 }
 0x1d8   :  { %v85_v36 = vadd.f32 %v84_v34, %v83_v32  ;;  %v73_v37 = vadd.f32 %v72_v35, %v71_v33 }
 0x1da   :  { %126 = vpush %v73_v37  ;;  %v86_v38 = vrot.slane %v85_v36, 1 }
 0x1dc   :  { %v87_v39 = vadd.f32 %v86_v38, %v85_v36 }
 0x1de   :  { %128 = vpush %v87_v39 }
 0x20b   :  { %s127_s0 = spop %126 }
 0x20c   :  { %s98_s15 = smul.f32 0.125, %s127_s0 }
 0x20e   :  { %s107_s18 = smul.f32 0.5, %s98_s15 }
 0x20f   :  { %s129_s1 = spop %128 }
 0x210   :  { %s100_s13 = smul.f32 2.0, %s129_s1 }
 0x212   :  { %s101_s14 = sadd.f32 1.0, %s100_s13 }
 0x214   :  { %s104_s16 = smul.f32 0.05882353, %s101_s14 }
 0x216   :  { %s105_s17 = ssub.f32 1.0, %s104_s16 }
 0x218   :  { %s106_s19 = smul.f32 0.5, %s105_s17 }
 0x21a   :  { %s108_s20 = sadd.f32 %s107_s18, %s106_s19 }
 0x21c   :  { %110 = sst [smem:[#allocation3]] %s108_s20 }
 0x21d   :  { %148 = shalt.err (!%p145_p2)
}
 0x21e   :  { %s152_s28 = smov [#allocation3]  }
 0x21f   :  { %118 = dma.smem_to_hbm %s152_s28, 16, %s192_s2, [#allocation4]  }
 0x220   :  { %149 = dma.done.wait [#allocation4], 16  }
 0x221   :  { %150 = vsyncadd [#allocation4], 4294967280 }
 0x222   :  { %122 = sfence }
 0x223   :  { %123 = vsyncpa [#allocation4], 1 }

</bundles_post_ra>
